<compile_context>
chip_gen: v7x
topology: tpu7x:2x2x1
jax: 0.10.0
libtpu: 0.0.40
codegen_flags: <defaults>
</compile_context>

<pallas_src>
import math
from functools import partial

import jax
import jax.numpy as jnp
from jax.experimental import pallas as pl
from jax.experimental.pallas import tpu as pltpu


def _attn_kernel(q_ref, k_ref, v_ref, mask_ref, o_ref, *, scale, keep_scale):
    # q_ref/k_ref/v_ref/o_ref blocks: (G, S, D); mask_ref block: (G, S, S)
    q = q_ref[...] * scale            # fold 1/inv_scale into q (bf16, G*S*D mul)
    k = k_ref[...]
    v = v_ref[...]

    # scores: batched matmul contracting last dims (no explicit transpose),
    # bf16 operands, f32 accumulation on the MXU.
    s = jnp.einsum("gqd,gkd->gqk", q, k, preferred_element_type=jnp.float32)

    # numerically stable softmax along the last axis (f32)
    row_max = jnp.max(s, axis=-1, keepdims=True)
    e = jnp.exp(s - row_max)
    denom = jnp.sum(e, axis=-1, keepdims=True)
    # fold dropout's 1/(1-p) rescale into the (G, S, 1) row normalizer
    inv = keep_scale / denom

    # softmax normalization + dropout keep-mask ({0,1}) in one pass
    w = e * inv * mask_ref[...].astype(jnp.float32)

    # output = dropout(softmax(qk/scale)) @ v  (bf16 operands, f32 accumulation)
    o_ref[...] = jnp.einsum(
        "gqk,gkd->gqd", w.astype(v.dtype), v, preferred_element_type=jnp.float32
    ).astype(o_ref.dtype)


def sdpa_dropout(
    query,
    key,
    value,
    *,
    inv_scale_factor=None,
    drop_p=0.5,
    rng_key=None,
    heads_per_block=None,
):
    """query/key/value: [B, H, S, D] float32. Returns [B, H, S, D] float32."""
    B, H, S, D = query.shape
    if inv_scale_factor is None:
        inv_scale_factor = math.sqrt(D)
    if not (0.0 <= drop_p < 1.0):
        raise ValueError("drop_p must be in [0, 1).")

    BH = B * H
    scale = 1.0 / float(inv_scale_factor)
    keep_scale = 1.0 / (1.0 - drop_p) if drop_p > 0.0 else 1.0

    # Pick heads-per-block: largest divisor of B*H whose per-step footprint
    # (double-buffered inputs/outputs + f32 score intermediates) stays modest.
    if heads_per_block is None:
        budget = 6 << 20  # ~6 MiB resident per step — safe on v5e/v6e/v7x
        best = 1
        for g in range(1, BH + 1):
            if BH % g:
                continue
            per_step = (
                (3 * g * S * D * 2      # q, k, v (bf16)
                 + g * S * D * 4        # output (f32)
                 + g * S * S * 2) * 2   # mask (bf16); x2 for double buffering
                + 2 * g * S * S * 4     # f32 scores + exp intermediates
            )
            if per_step <= budget:
                best = g
        heads_per_block = best
    G = heads_per_block
    assert BH % G == 0

    qf = query.reshape(BH, S, D).astype(jnp.bfloat16)
    kf = key.reshape(BH, S, D).astype(jnp.bfloat16)
    vf = value.reshape(BH, S, D).astype(jnp.bfloat16)

    if drop_p > 0.0:
        if rng_key is None:
            rng_key = jax.random.PRNGKey(0)
        keep = jax.random.uniform(rng_key, (BH, S, S)) >= drop_p
        mask = keep.astype(jnp.bfloat16)
    else:
        mask = jnp.ones((BH, S, S), dtype=jnp.bfloat16)

    head_spec = pl.BlockSpec((G, S, D), lambda i: (i, 0, 0))
    mask_spec = pl.BlockSpec((G, S, S), lambda i: (i, 0, 0))

    kernel = partial(_attn_kernel, scale=scale, keep_scale=keep_scale)

    out = pl.pallas_call(
        kernel,
        out_shape=jax.ShapeDtypeStruct((BH, S, D), jnp.float32),
        grid=(BH // G,),
        in_specs=[head_spec, head_spec, head_spec, mask_spec],
        out_specs=head_spec,
        compiler_params=pltpu.CompilerParams(
            dimension_semantics=("parallel",)
        ),
    )(qf, kf, vf, mask)

    return out.reshape(B, H, S, D)


if __name__ == "__main__":
    B, H, S, D = 2, 4, 8, 32
    key0 = jax.random.PRNGKey(0)
    kq, kk, kv, kdrop = jax.random.split(key0, 4)
    query = jax.random.normal(kq, (B, H, S, D), dtype=jnp.float32)
    key_t = jax.random.normal(kk, (B, H, S, D), dtype=jnp.float32)
    value = jax.random.normal(kv, (B, H, S, D), dtype=jnp.float32)

    out = sdpa_dropout(
        query,
        key_t,
        value,
        inv_scale_factor=math.sqrt(D),
        drop_p=0.5,
        rng_key=kdrop,
    )
    jax.block_until_ready(out)
    assert out.shape == (B, H, S, D)
    assert jnp.isfinite(out).all()
    print("KERNEL_OK")
</pallas_src>

<mosaic_0001>
module attributes {stable_mosaic.version = 11 : i64} {
  func.func @_attn_kernel(%arg0: i32, %arg1: memref<8x8x32xbf16, #tpu.memory_space<vmem>>, %arg2: memref<8x8x32xbf16, #tpu.memory_space<vmem>>, %arg3: memref<8x8x32xbf16, #tpu.memory_space<vmem>>, %arg4: memref<8x8x8xbf16, #tpu.memory_space<vmem>>, %arg5: memref<8x8x32xf32, #tpu.memory_space<vmem>>) attributes {dimension_semantics = [#tpu.dimension_semantics<parallel>], iteration_bounds = array<i64: 1>, scalar_prefetch = 0 : i64, scratch_operands = 0 : i64, tpu.core_type = #tpu.core_type<tc>, window_params = [{transform_indices = @transform_0, window_bounds = array<i64: 8, 8, 32>}, {transform_indices = @transform_1, window_bounds = array<i64: 8, 8, 32>}, {transform_indices = @transform_2, window_bounds = array<i64: 8, 8, 32>}, {transform_indices = @transform_3, window_bounds = array<i64: 8, 8, 8>}, {transform_indices = @transform_4, window_bounds = array<i64: 8, 8, 32>}]} {
    %c0 = arith.constant 0 : index
    %c0_0 = arith.constant 0 : index
    %c0_1 = arith.constant 0 : index
    %0 = vector.load %arg1[%c0, %c0_0, %c0_1] : memref<8x8x32xbf16, #tpu.memory_space<vmem>>, vector<8x8x32xbf16>
    %cst = arith.constant 1.767580e-01 : bf16
    %1 = vector.broadcast %cst : bf16 to vector<8x8x32xbf16>
    %2 = arith.mulf %0, %1 : vector<8x8x32xbf16>
    %c0_2 = arith.constant 0 : index
    %c0_3 = arith.constant 0 : index
    %c0_4 = arith.constant 0 : index
    %3 = vector.load %arg2[%c0_2, %c0_3, %c0_4] : memref<8x8x32xbf16, #tpu.memory_space<vmem>>, vector<8x8x32xbf16>
    %c0_5 = arith.constant 0 : index
    %c0_6 = arith.constant 0 : index
    %c0_7 = arith.constant 0 : index
    %4 = vector.load %arg3[%c0_5, %c0_6, %c0_7] : memref<8x8x32xbf16, #tpu.memory_space<vmem>>, vector<8x8x32xbf16>
    "tpu.trace_start"() <{level = 10 : i32, message = "gqd,gkd->gqk"}> : () -> ()
    %cst_8 = arith.constant dense<0.000000e+00> : vector<8x8x8xf32>
    %5 = tpu.matmul %2, %3, %cst_8 {dimension_numbers = #tpu.dot_dimension_numbers<[2], [2], [1], [1], [0, 0, 0, 1, 1, 1], [0], [0]>} : vector<8x8x32xbf16>, vector<8x8x32xbf16>, vector<8x8x8xf32> -> vector<8x8x8xf32>
    "tpu.trace_stop"() : () -> ()
    %cst_9 = arith.constant dense<0xFF800000> : vector<8x8xf32>
    %6 = vector.multi_reduction <maximumf>, %5, %cst_9 [2] : vector<8x8x8xf32> to vector<8x8xf32>
    %7 = vector.shape_cast %6 : vector<8x8xf32> to vector<8x8x1xf32>
    %8 = vector.broadcast %7 : vector<8x8x1xf32> to vector<8x8x8xf32>
    %9 = arith.subf %5, %8 : vector<8x8x8xf32>
    %10 = math.exp %9 : vector<8x8x8xf32>
    %cst_10 = arith.constant dense<0.000000e+00> : vector<8x8xf32>
    %11 = vector.multi_reduction <add>, %10, %cst_10 [2] : vector<8x8x8xf32> to vector<8x8xf32>
    %12 = vector.shape_cast %11 : vector<8x8xf32> to vector<8x8x1xf32>
    %cst_11 = arith.constant 2.000000e+00 : f32
    %13 = vector.broadcast %cst_11 : f32 to vector<8x8x1xf32>
    %14 = arith.divf %13, %12 : vector<8x8x1xf32>
    %15 = vector.broadcast %14 : vector<8x8x1xf32> to vector<8x8x8xf32>
    %16 = arith.mulf %10, %15 : vector<8x8x8xf32>
    %c0_12 = arith.constant 0 : index
    %c0_13 = arith.constant 0 : index
    %c0_14 = arith.constant 0 : index
    %17 = vector.load %arg4[%c0_12, %c0_13, %c0_14] : memref<8x8x8xbf16, #tpu.memory_space<vmem>>, vector<8x8x8xbf16>
    %18 = arith.extf %17 : vector<8x8x8xbf16> to vector<8x8x8xf32>
    %19 = arith.mulf %16, %18 : vector<8x8x8xf32>
    %20 = arith.truncf %19 : vector<8x8x8xf32> to vector<8x8x8xbf16>
    "tpu.trace_start"() <{level = 10 : i32, message = "gqk,gkd->gqd"}> : () -> ()
    %cst_15 = arith.constant dense<0.000000e+00> : vector<8x8x32xf32>
    %21 = tpu.matmul %20, %4, %cst_15 {dimension_numbers = #tpu.dot_dimension_numbers<[2], [1], [1], [2], [0, 0, 0, 1, 1, 2], [0], [0]>} : vector<8x8x8xbf16>, vector<8x8x32xbf16>, vector<8x8x32xf32> -> vector<8x8x32xf32>
    "tpu.trace_stop"() : () -> ()
    %c0_16 = arith.constant 0 : index
    %c0_17 = arith.constant 0 : index
    %c0_18 = arith.constant 0 : index
    %22 = vector.load %arg5[%c0_16, %c0_17, %c0_18] : memref<8x8x32xf32, #tpu.memory_space<vmem>>, vector<8x8x32xf32>
    tpu.vector_store %arg5[%c0_16, %c0_17, %c0_18], %21 {strides = array<i32>} : memref<8x8x32xf32, #tpu.memory_space<vmem>>, vector<8x8x32xf32>,
    return
  }
  func.func @transform_0(%arg0: i32) -> (i32, i32, i32) {
    %c0_i32 = arith.constant 0 : i32
    %c0_i32_0 = arith.constant 0 : i32
    %c0_i32_1 = arith.constant 0 : i32
    return %arg0, %c0_i32, %c0_i32_0 : i32, i32, i32
  }
  func.func @transform_1(%arg0: i32) -> (i32, i32, i32) {
    %c0_i32 = arith.constant 0 : i32
    %c0_i32_0 = arith.constant 0 : i32
    %c0_i32_1 = arith.constant 0 : i32
    return %arg0, %c0_i32, %c0_i32_0 : i32, i32, i32
  }
  func.func @transform_2(%arg0: i32) -> (i32, i32, i32) {
    %c0_i32 = arith.constant 0 : i32
    %c0_i32_0 = arith.constant 0 : i32
    %c0_i32_1 = arith.constant 0 : i32
    return %arg0, %c0_i32, %c0_i32_0 : i32, i32, i32
  }
  func.func @transform_3(%arg0: i32) -> (i32, i32, i32) {
    %c0_i32 = arith.constant 0 : i32
    %c0_i32_0 = arith.constant 0 : i32
    %c0_i32_1 = arith.constant 0 : i32
    return %arg0, %c0_i32, %c0_i32_0 : i32, i32, i32
  }
  func.func @transform_4(%arg0: i32) -> (i32, i32, i32) {
    %c0_i32 = arith.constant 0 : i32
    %c0_i32_0 = arith.constant 0 : i32
    %c0_i32_1 = arith.constant 0 : i32
    return %arg0, %c0_i32, %c0_i32_0 : i32, i32, i32
  }
}

</mosaic_0001>

<bundles_post_ra>
// kernel: tpu_custom_call.1
= control target key start
LH: loop header
LB: loop body
LE: loop exit
PB: predicated region body
PF: predicated region fallthrough
CT: control target
= control target key end

     0   :  { %9 = vsyncpa [#allocation3], 0  ;;  %s1583_s0 = inlined_call_operand.hbm [shape: bf16[8,8,32], index: 0, kind: input, shape index: {}]   ;;  %s1584_s1 = inlined_call_operand.hbm [shape: bf16[8,8,32], index: 1, kind: input, shape index: {}]   ;;  %s1585_s2 = inlined_call_operand.hbm [shape: bf16[8,8,32], index: 2, kind: input, shape index: {}]   ;;  %s1586_s3 = inlined_call_operand.hbm [shape: bf16[8,8,8], index: 3, kind: input, shape index: {}]   ;;  %s1587_s4 = inlined_call_operand.hbm [shape: f32[8,8,32], index: 4, kind: output, shape index: {}]  }
   0x1   :  { %10 = vsyncpa [#allocation6], 0 }
   0x2   :  { %11 = vsyncpa [#allocation9], 0 }
   0x3   :  { %12 = vsyncpa [#allocation4], 0  ;;  %s1325_s15 = smov [#allocation5]   ;;  %s1326_s17 = smov [#allocation2]  }
   0x4   :  { %s30_s16 = sshll.u32 %s1325_s15, 4  ;;  %s18_s18 = sshll.u32 %s1326_s17, 4  ;;  %s31_s16 = int_to_ptr.vmem [resolvable:$true] %s30_s16  ;;  %s1361_s18 = int_to_ptr.vmem [resolvable:$true] %s18_s18 }
   0x5   :  { %s1207_s21 = scalar_lea.hbm %s1584_s1, 512 }
   0x6   :  { %p1208_p0 = scmp.ne.s32.totalorder %s1584_s1, %s1207_s21  ;;  %p1211_p1 = scmp.lt.u32.totalorder %s1207_s21, %s1584_s1 }
   0x8   :  { %p1213_p2 = pnand %p1211_p1, %p1208_p0 }
   0xa   :  { %1216 = shalt.err (!%p1213_p2)
}
   0xb   :  { %s1217_s26 = scalar_lea.vmem %s31_s16, 512  ;;  %p1222_p4 = scmp.lt.s32.totalorder %s31_s16, %s31_s16 }
   0xc   :  { %p1218_p3 = scmp.ne.s32.totalorder %s31_s16, %s1217_s26  ;;  %p1223_p5 = scmp.lt.s32.totalorder %s1217_s26, %s1217_s26 }
   0xe   :  { %p1224_p6 = por %p1223_p5, %p1222_p4 }
  0x10   :  { %p1225_p7 = pnand %p1224_p6, %p1218_p3 }
  0x12   :  { %1228 = shalt.err (!%p1225_p7)
}
  0x13   :  { %s1327_s27 = smov 64   ;;  %s1328_s28 = smov 4  }
  0x14   :  { %36 = dma.hbm_to_vmem [thread:$0]  %s1584_s1, 512, %s31_s16, [#allocation6], %s1327_s27, %s1327_s27, %s1328_s28  }
  0x15   :  { %s1229_s7 = scalar_lea.hbm %s1583_s0, 512 }
  0x16   :  { %p1230_p8 = scmp.ne.s32.totalorder %s1583_s0, %s1229_s7  ;;  %p1233_p9 = scmp.lt.u32.totalorder %s1229_s7, %s1583_s0 }
  0x18   :  { %p1235_p10 = pnand %p1233_p9, %p1230_p8 }
  0x1a   :  { %1238 = shalt.err (!%p1235_p10)
}
  0x1b   :  { %s1239_s12 = scalar_lea.vmem %s1361_s18, 512  ;;  %p1244_p12 = scmp.lt.s32.totalorder %s1361_s18, %s1361_s18 }
  0x1c   :  { %p1240_p11 = scmp.ne.s32.totalorder %s1361_s18, %s1239_s12  ;;  %p1245_p13 = scmp.lt.s32.totalorder %s1239_s12, %s1239_s12 }
  0x1e   :  { %p1246_p0 = por %p1245_p13, %p1244_p12 }
  0x20   :  { %p1247_p1 = pnand %p1246_p0, %p1240_p11 }
  0x22   :  { %1250 = shalt.err (!%p1247_p1)
}
  0x23   :  { %24 = dma.hbm_to_vmem [thread:$0]  %s1583_s0, 512, %s1361_s18, [#allocation3], %s1327_s27, %s1327_s27, %s1328_s28  }
  0x24   :  { %s1329_s14 = smov [#allocation7]   ;;  %s1330_s16 = smov [#allocation8]  }
  0x25   :  { %s42_s15 = sshll.u32 %s1329_s14, 4  ;;  %s54_s17 = sshll.u32 %s1330_s16, 4  ;;  %s43_s15 = int_to_ptr.vmem [resolvable:$true] %s42_s15  ;;  %s1398_s17 = int_to_ptr.vmem [resolvable:$true] %s54_s17 }
  0x26   :  { %s1251_s21 = scalar_lea.hbm %s1585_s2, 512 }
  0x27   :  { %p1252_p2 = scmp.ne.s32.totalorder %s1585_s2, %s1251_s21  ;;  %p1255_p3 = scmp.lt.u32.totalorder %s1251_s21, %s1585_s2 }
  0x29   :  { %p1257_p4 = pnand %p1255_p3, %p1252_p2 }
  0x2b   :  { %1260 = shalt.err (!%p1257_p4)
}
  0x2c   :  { %s1261_s0 = scalar_lea.vmem %s43_s15, 512  ;;  %p1266_p6 = scmp.lt.s32.totalorder %s43_s15, %s43_s15 }
  0x2d   :  { %p1262_p5 = scmp.ne.s32.totalorder %s43_s15, %s1261_s0  ;;  %p1267_p7 = scmp.lt.s32.totalorder %s1261_s0, %s1261_s0 }
  0x2f   :  { %p1268_p8 = por %p1267_p7, %p1266_p6 }
  0x31   :  { %p1269_p9 = pnand %p1268_p8, %p1262_p5 }
  0x33   :  { %1272 = shalt.err (!%p1269_p9)
}
  0x34   :  { %48 = dma.hbm_to_vmem [thread:$0]  %s1585_s2, 512, %s43_s15, [#allocation6], %s1327_s27, %s1327_s27, %s1328_s28  }
  0x35   :  { %s1273_s5 = scalar_lea.hbm %s1586_s3, 512 }
  0x36   :  { %p1274_p10 = scmp.ne.s32.totalorder %s1586_s3, %s1273_s5  ;;  %p1277_p11 = scmp.lt.u32.totalorder %s1273_s5, %s1586_s3 }
  0x38   :  { %p1279_p12 = pnand %p1277_p11, %p1274_p10 }
  0x3a   :  { %1282 = shalt.err (!%p1279_p12)
}
  0x3b   :  { %s1283_s10 = scalar_lea.vmem %s1398_s17, 512  ;;  %p1288_p0 = scmp.lt.s32.totalorder %s1398_s17, %s1398_s17 }
  0x3c   :  { %p1284_p13 = scmp.ne.s32.totalorder %s1398_s17, %s1283_s10  ;;  %p1289_p1 = scmp.lt.s32.totalorder %s1283_s10, %s1283_s10 }
  0x3e   :  { %p1290_p2 = por %p1289_p1, %p1288_p0 }
  0x40   :  { %p1291_p3 = pnand %p1290_p2, %p1284_p13 }
  0x42   :  { %1294 = shalt.err (!%p1291_p3)
}
  0x43   :  { %60 = dma.hbm_to_vmem [thread:$0]  %s1586_s3, 512, %s1398_s17, [#allocation9], %s1327_s27, %s1327_s27, %s1328_s28  }
  0x44   :  { %1317 = dma.done.wait [#allocation3], 512  }
  0x45   :  { %1318 = vsyncadd [#allocation3], 4294966784 }
  0x46   :  { %1319 = dma.done.wait [#allocation6], 1024  }
  0x47   :  { %1320 = vsyncadd [#allocation6], 4294966272 }
  0x48   :  { %1321 = dma.done.wait [#allocation9], 512  }
  0x49   :  { %1322 = vsyncadd [#allocation9], 4294966784  ;;  %v1331_v0 = vmov 0.0   ;;  %vm1332_vm0 = vmmov 0   ;;  %vm107_vm1 = vcmask 261120   ;;  %vm476_vm2 = vcmask 64512  }
  0x4a   :  { %1068 = vmatprep.subr.bf16.mxu0 %v1331_v0  ;;  %1074 = vmatprep.subr.bf16.mxu1 %v1331_v0  ;;  %v91_v1 = vld [vmem:[#allocation5] sm:$0xf]  ;;  %v92_v2 = vld [vmem:[#allocation5 + $0x4] sm:$0xf]  ;;  %v93_v7 = vld [vmem:[#allocation5 + $0x8] sm:$0xf] }
  0x4b   :  { %1070 = vmatprep.mubr.msk.bf16.mxu0 %vm1332_vm0, %v1331_v0  ;;  %1076 = vmatprep.mubr.msk.bf16.mxu1 %vm1332_vm0, %v1331_v0  ;;  %v112_v3 = vsel %vm107_vm1, %v91_v1, 0  ;;  %v158_v4 = vsel %vm107_vm1, %v92_v2, 0  ;;  %v75_v5 = vld [vmem:[#allocation2] sm:$0xf]  ;;  %v76_v6 = vld [vmem:[#allocation2 + $0x4] sm:$0xf] }
  0x4c   :  { %1069 = vmatpush3.bf16.xpose.msra.mxu0 %v112_v3  ;;  %1075 = vmatpush3.bf16.xpose.msra.mxu1 %v158_v4  ;;  %v94_v8 = vld [vmem:[#allocation5 + $0xc] sm:$0xf]  ;;  %v83_v9 = vmul.bf16 1043676725, %v75_v5  ;;  %v84_v10 = vmul.bf16 1043676725, %v76_v6 }
  0x4d   :  { %1080 = vmatprep.subr.bf16.mxu0 %v1331_v0  ;;  %1086 = vmatprep.subr.bf16.mxu1 %v1331_v0  ;;  %v204_v11 = vsel %vm107_vm1, %v93_v7, 0  ;;  %v250_v12 = vsel %vm107_vm1, %v94_v8, 0  ;;  %v77_v13 = vld [vmem:[#allocation2 + $0x8] sm:$0xf]  ;;  %v78_v14 = vld [vmem:[#allocation2 + $0xc] sm:$0xf] }
  0x4e   :  { %v95_v15 = vld [vmem:[#allocation5 + $0x10] sm:$0xf]  ;;  %v96_v16 = vld [vmem:[#allocation5 + $0x14] sm:$0xf]  ;;  %v85_v17 = vmul.bf16 1043676725, %v77_v13 }
  0x4f   :  { %v86_v18 = vmul.bf16 1043676725, %v78_v14  ;;  %v296_v19 = vsel %vm107_vm1, %v95_v15, 0  ;;  %v342_v20 = vsel %vm107_vm1, %v96_v16, 0  ;;  %v79_v21 = vld [vmem:[#allocation2 + $0x10] sm:$0xf] }
  0x50   :  { %v80_v22 = vld [vmem:[#allocation2 + $0x14] sm:$0xf]  ;;  %v97_v23 = vld [vmem:[#allocation5 + $0x18] sm:$0xf]  ;;  %v98_v24 = vld [vmem:[#allocation5 + $0x1c] sm:$0xf] }
  0x51   :  { %v87_v25 = vmul.bf16 1043676725, %v79_v21  ;;  %v88_v26 = vmul.bf16 1043676725, %v80_v22  ;;  %v388_v27 = vsel %vm107_vm1, %v97_v23, 0  ;;  %v434_v28 = vsel %vm107_vm1, %v98_v24, 0 }
  0x52   :  { %v81_v29 = vld [vmem:[#allocation2 + $0x18] sm:$0xf]  ;;  %v82_v30 = vld [vmem:[#allocation2 + $0x1c] sm:$0xf]  ;;  %vm608_vm3 = vcmask 1043456   ;;  %s1333_s3 = smov [#allocation10]  }
  0x53   :  { %1071 = vmatmul.mubr.msk.bf16.vlgmr.msra.gmra.mrb[0].mxu0 %vm107_vm1, %v83_v9  ;;  %1077 = vmatmul.mubr.msk.bf16.vlgmr.msra.gmra.mrb[0].mxu1 %vm107_vm1, %v84_v10  ;;  %v89_v31 = vmul.bf16 1043676725, %v81_v29  ;;  %v90_v32 = vmul.bf16 1043676725, %v82_v30  ;;  %s987_s27 = sshll.u32 %s1333_s3, 4  ;;  %s988_s27 = int_to_ptr.vmem [resolvable:$true] %s987_s27 }
  0x54   :  { %1081 = vmatpush3.bf16.xpose.msra.mxu0 %v204_v11  ;;  %1087 = vmatpush3.bf16.xpose.msra.mxu1 %v250_v12  ;;  %s1295_s28 = scalar_lea.vmem %s988_s27, 1024  ;;  %p1300_p5 = scmp.lt.s32.totalorder %s988_s27, %s988_s27 }
  0x55   :  { %1082 = vmatprep.mubr.msk.bf16.mxu0 %vm1332_vm0, %v1331_v0  ;;  %1088 = vmatprep.mubr.msk.bf16.mxu1 %vm1332_vm0, %v1331_v0  ;;  %p1296_p4 = scmp.ne.s32.totalorder %s988_s27, %s1295_s28  ;;  %p1301_p6 = scmp.lt.s32.totalorder %s1295_s28, %s1295_s28 }
  0x56   :  { %1092 = vmatprep.subr.bf16.mxu0 %v1331_v0  ;;  %1098 = vmatprep.subr.bf16.mxu1 %v1331_v0 }
  0x57   :  { %p1302_p7 = por %p1301_p6, %p1300_p5 }
  0x59   :  { %p1303_p8 = pnand %p1302_p7, %p1296_p4 }
  0x5b   :  { %1083 = vmatmul.mubr.msk.bf16.vlgmr.msra.gmra.mrb[4].mxu0 %vm107_vm1, %v85_v17  ;;  %1089 = vmatmul.mubr.msk.bf16.vlgmr.msra.gmra.mrb[4].mxu1 %vm107_vm1, %v86_v18 }
  0x5c   :  { %1093 = vmatpush3.bf16.xpose.msra.mxu0 %v296_v19  ;;  %1099 = vmatpush3.bf16.xpose.msra.mxu1 %v342_v20 }
  0x5d   :  { %1094 = vmatprep.mubr.msk.bf16.mxu0 %vm1332_vm0, %v1331_v0  ;;  %1100 = vmatprep.mubr.msk.bf16.mxu1 %vm1332_vm0, %v1331_v0 }
  0x5e   :  { %1104 = vmatprep.subr.bf16.mxu0 %v1331_v0  ;;  %1110 = vmatprep.subr.bf16.mxu1 %v1331_v0 }
  0x63   :  { %1095 = vmatmul.mubr.msk.bf16.vlgmr.msra.gmra.mrb[8].mxu0 %vm107_vm1, %v87_v25  ;;  %1101 = vmatmul.mubr.msk.bf16.vlgmr.msra.gmra.mrb[8].mxu1 %vm107_vm1, %v88_v26 }
  0x64   :  { %1105 = vmatpush3.bf16.xpose.msra.mxu0 %v388_v27  ;;  %1111 = vmatpush3.bf16.xpose.msra.mxu1 %v434_v28 }
  0x65   :  { %1106 = vmatprep.mubr.msk.bf16.mxu0 %vm1332_vm0, %v1331_v0  ;;  %1112 = vmatprep.mubr.msk.bf16.mxu1 %vm1332_vm0, %v1331_v0 }
  0x66   :  { %1116 = vmatprep.subr.bf16.mxu0 %v1331_v0  ;;  %1122 = vmatprep.subr.bf16.mxu1 %v1331_v0 }
  0x6b   :  { %1107 = vmatmul.mubr.msk.bf16.vlgmr.msra.gmra.mrb[12].mxu0 %vm107_vm1, %v89_v31  ;;  %1113 = vmatmul.mubr.msk.bf16.vlgmr.msra.gmra.mrb[12].mxu1 %vm107_vm1, %v90_v32 }
  0x6c   :  { %1118 = vmatprep.mubr.msk.bf16.mxu0 %vm1332_vm0, %v1331_v0  ;;  %1124 = vmatprep.mubr.msk.bf16.mxu1 %vm1332_vm0, %v1331_v0 }
 0x126   :  { %v148_v33 = vpop.f32.mrb[0].mxu0  ;;  %v194_v34 = vpop.f32.mrb[0].mxu1 }
 0x127   :  { %v1072_v35 = vpop.f32.mrb[1].mxu0  ;;  %v477_v36 = vsel %vm476_vm2, %v148_v33, -inf  ;;  %v1078_v37 = vpop.f32.mrb[1].mxu1  ;;  %v480_v42 = vsel %vm476_vm2, %v194_v34, -inf }
 0x128   :  { %478 = vmax.xlane.f32.xlu0 %v477_v36  ;;  %v151_v38 = vpop.f32.mrb[2].mxu0  ;;  %v197_v39 = vpop.f32.mrb[2].mxu1 }
 0x129   :  { %v1073_v40 = vpop.f32.mrb[3].mxu0  ;;  %v1079_v41 = vpop.f32.mrb[3].mxu1 }
 0x12c   :  { %481 = vmax.xlane.f32.xlu0 %v480_v42 }
 0x12e   :  { %v240_v43 = vpop.f32.mrb[4].mxu0  ;;  %v286_v44 = vpop.f32.mrb[4].mxu1 }
 0x12f   :  { %v1084_v45 = vpop.f32.mrb[5].mxu0  ;;  %v483_v46 = vsel %vm476_vm2, %v240_v43, -inf  ;;  %v1090_v47 = vpop.f32.mrb[5].mxu1  ;;  %v486_v52 = vsel %vm476_vm2, %v286_v44, -inf }
 0x130   :  { %484 = vmax.xlane.f32.xlu1 %v483_v46  ;;  %v243_v48 = vpop.f32.mrb[6].mxu0  ;;  %v289_v49 = vpop.f32.mrb[6].mxu1 }
 0x131   :  { %v1085_v50 = vpop.f32.mrb[7].mxu0  ;;  %v1091_v51 = vpop.f32.mrb[7].mxu1 }
 0x132   :  { %v99_v50 = vld [vmem:[#allocation7] sm:$0xf] }
 0x133   :  { %v610_v51 = vsel %vm608_vm3, %v99_v50, 0 }
 0x134   :  { %487 = vmax.xlane.f32.xlu1 %v486_v52  ;;  %1117 = vmatpush3.bf16.msra.mxu0 %v610_v51  ;;  %v100_v52 = vld [vmem:[#allocation7 + $0x4] sm:$0xf] }
 0x135   :  { %1128 = vmatprep.subr.bf16.mxu0 %v1331_v0 }
 0x136   :  { %v332_v53 = vpop.f32.mrb[8].mxu0  ;;  %v378_v54 = vpop.f32.mrb[8].mxu1 }
 0x137   :  { %v492_v55 = vsel %vm476_vm2, %v378_v54, -inf  ;;  %v489_v56 = vsel %vm476_vm2, %v332_v53, -inf  ;;  %v1096_v57 = vpop.f32.mrb[9].mxu0  ;;  %v1102_v58 = vpop.f32.mrb[9].mxu1 }
 0x138   :  { %493 = vmax.xlane.f32.xlu1 %v492_v55  ;;  %490 = vmax.xlane.f32.xlu0 %v489_v56  ;;  %v335_v59 = vpop.f32.mrb[10].mxu0  ;;  %v381_v60 = vpop.f32.mrb[10].mxu1  ;;  %v1018_v57 = vld [vmem:[#allocation8] sm:$0xff]  }
 0x139   :  { %v1097_v61 = vpop.f32.mrb[11].mxu0  ;;  %v1103_v62 = vpop.f32.mrb[11].mxu1  ;;  %v1019_v59 = vunpack.c.l.bf16 %v1018_v57 }
 0x13e   :  { %v424_v63 = vpop.f32.mrb[12].mxu0  ;;  %v470_v1 = vpop.f32.mrb[12].mxu1 }
 0x13f   :  { %v498_v2 = vsel %vm476_vm2, %v470_v1, -inf  ;;  %v495_v3 = vsel %vm476_vm2, %v424_v63, -inf  ;;  %v1108_v4 = vpop.f32.mrb[13].mxu0  ;;  %v1114_v5 = vpop.f32.mrb[13].mxu1 }
 0x140   :  { %499 = vmax.xlane.f32.xlu1 %v498_v2  ;;  %496 = vmax.xlane.f32.xlu0 %v495_v3  ;;  %v427_v6 = vpop.f32.mrb[14].mxu0  ;;  %v473_v7 = vpop.f32.mrb[14].mxu1  ;;  %v1020_v3 = vunpack.c.h.bf16 %v1018_v57 }
 0x141   :  { %v1109_v8 = vpop.f32.mrb[15].mxu0  ;;  %v1115_v9 = vpop.f32.mrb[15].mxu1  ;;  %v1033_v6 = vld [vmem:[#allocation8 + $0x8] sm:$0xff]  }
 0x1b5   :  { %v479_v10 = vpop.xlane.xlu0 %478 }
 0x1b6   :  { %v501_v11 = vsub.f32 %v148_v33, %v479_v10 }
 0x1b8   :  { %v509_v12 = vmul.f32 1.442695, %v501_v11 }
 0x1b9   :  { %v482_v13 = vpop.xlane.xlu0 %481 }
 0x1ba   :  { %1175 = vpow2.f32 %v509_v12  ;;  %v502_v14 = vsub.f32 %v194_v34, %v482_v13  ;;  %v102_v12 = vld [vmem:[#allocation7 + $0xc] sm:$0xf] }
 0x1bc   :  { %v511_v15 = vmul.f32 1.442695, %v502_v14  ;;  %v1023_v14 = vunpack.c.l.bf16 %v1033_v6 }
 0x1bd   :  { %v485_v16 = vpop.xlane.xlu1 %484 }
 0x1be   :  { %1177 = vpow2.f32 %v511_v15  ;;  %v503_v17 = vsub.f32 %v240_v43, %v485_v16 }
 0x1c0   :  { %v513_v18 = vmul.f32 1.442695, %v503_v17 }
 0x1c1   :  { %v488_v19 = vpop.xlane.xlu1 %487 }
 0x1c2   :  { %1179 = vpow2.f32 %v513_v18  ;;  %v504_v20 = vsub.f32 %v286_v44, %v488_v19  ;;  %v748_v18 = vsel %vm608_vm3, %v102_v12, 0 }
 0x1c4   :  { %v1489_v21 = vpop.eup %1175  ;;  %v515_v22 = vmul.f32 1.442695, %v504_v20  ;;  %v103_v20 = vld [vmem:[#allocation7 + $0x10] sm:$0xf] }
 0x1c5   :  { %v494_v23 = vpop.xlane.xlu1 %493  ;;  %v491_v24 = vpop.xlane.xlu0 %490  ;;  %v525_v25 = vsel %vm476_vm2, %v1489_v21, 0.0 }
 0x1c6   :  { %1181 = vpow2.f32 %v515_v22  ;;  %v506_v26 = vsub.f32 %v378_v54, %v494_v23  ;;  %v505_v27 = vsub.f32 %v332_v53, %v491_v24  ;;  %526 = vadd.xlane.f32.xlu0 %v525_v25  ;;  %v656_v53 = vsel %vm608_vm3, %v100_v52, 0  ;;  %v106_v52 = vld [vmem:[#allocation7 + $0x1c] sm:$0xf] }
 0x1c7   :  { %1123 = vmatpush3.bf16.msra.mxu1 %v656_v53  ;;  %v1024_v22 = vunpack.c.h.bf16 %v1033_v6 }
 0x1c8   :  { %v1493_v28 = vpop.eup %1177  ;;  %v519_v29 = vmul.f32 1.442695, %v506_v26  ;;  %v517_v30 = vmul.f32 1.442695, %v505_v27  ;;  %1134 = vmatprep.subr.bf16.mxu1 %v1331_v0 }
 0x1c9   :  { %v528_v31 = vsel %vm476_vm2, %v1493_v28, 0.0 }
 0x1ca   :  { %1183 = vpow2.f32 %v519_v29  ;;  %529 = vadd.xlane.f32.xlu1 %v528_v31  ;;  %v794_v29 = vsel %vm608_vm3, %v103_v20, 0  ;;  %v104_v31 = vld [vmem:[#allocation7 + $0x14] sm:$0xf] }
 0x1cb   :  { %1185 = vpow2.f32 %v517_v30 }
 0x1cc   :  { %v1497_v32 = vpop.eup %1179 }
 0x1cd   :  { %v500_v33 = vpop.xlane.xlu1 %499  ;;  %v497_v34 = vpop.xlane.xlu0 %496  ;;  %v531_v35 = vsel %vm476_vm2, %v1497_v32, 0.0 }
 0x1ce   :  { %v508_v36 = vsub.f32 %v470_v1, %v500_v33  ;;  %v507_v37 = vsub.f32 %v424_v63, %v497_v34  ;;  %532 = vadd.xlane.f32.xlu0 %v531_v35  ;;  %v101_v1 = vld [vmem:[#allocation7 + $0x8] sm:$0xf] }
 0x1cf   :  { %v702_v10 = vsel %vm608_vm3, %v101_v1, 0 }
 0x1d0   :  { %v1501_v38 = vpop.eup %1181  ;;  %v523_v39 = vmul.f32 1.442695, %v508_v36  ;;  %v521_v40 = vmul.f32 1.442695, %v507_v37 }
 0x1d1   :  { %v534_v41 = vsel %vm476_vm2, %v1501_v38, 0.0 }
 0x1d2   :  { %1187 = vpow2.f32 %v523_v39  ;;  %535 = vadd.xlane.f32.xlu1 %v534_v41 }
 0x1d3   :  { %1189 = vpow2.f32 %v521_v40  ;;  %v840_v40 = vsel %vm608_vm3, %v104_v31, 0 }
 0x1d4   :  { %v1505_v42 = vpop.eup %1183 }
 0x1d5   :  { %v1507_v43 = vpop.eup %1185  ;;  %v540_v44 = vsel %vm476_vm2, %v1505_v42, 0.0 }
 0x1d6   :  { %541 = vadd.xlane.f32.xlu1 %v540_v44  ;;  %v537_v45 = vsel %vm476_vm2, %v1507_v43, 0.0  ;;  %v105_v44 = vld [vmem:[#allocation7 + $0x18] sm:$0xf] }
 0x1d7   :  { %538 = vadd.xlane.f32.xlu0 %v537_v45  ;;  %v886_v51 = vsel %vm608_vm3, %v105_v44, 0 }
 0x1dc   :  { %v1513_v46 = vpop.eup %1187 }
 0x1dd   :  { %v1515_v47 = vpop.eup %1189  ;;  %v546_v48 = vsel %vm476_vm2, %v1513_v46, 0.0 }
 0x1de   :  { %547 = vadd.xlane.f32.xlu1 %v546_v48  ;;  %v543_v49 = vsel %vm476_vm2, %v1515_v47, 0.0 }
 0x1df   :  { %544 = vadd.xlane.f32.xlu0 %v543_v49  ;;  %v1035_v49 = vld [vmem:[#allocation8 + $0x18] sm:$0xff]  }
 0x1e0   :  { %v1032_v57 = vunpack.c.h.bf16 %v1035_v49 }
 0x253   :  { %v527_v54 = vpop.xlane.xlu0 %526 }
 0x254   :  { %1191 = vrcp.f32 %v527_v54 }
 0x257   :  { %v530_v55 = vpop.xlane.xlu1 %529 }
 0x258   :  { %1193 = vrcp.f32 %v530_v55 }
 0x25b   :  { %v533_v56 = vpop.xlane.xlu0 %532 }
 0x25c   :  { %1195 = vrcp.f32 %v533_v56 }
 0x25e   :  { %v1192_v58 = vpop.eup %1191 }
 0x25f   :  { %v550_v60 = vmul.f32 2.0, %v1192_v58  ;;  %v536_v61 = vpop.xlane.xlu1 %535 }
 0x260   :  { %1197 = vrcp.f32 %v536_v61 }
 0x261   :  { %v565_v62 = vmul.f32 %v1489_v21, %v550_v60 }
 0x262   :  { %v1194_v63 = vpop.eup %1193 }
 0x263   :  { %v589_v2 = vmul.f32 %v1019_v59, %v565_v62  ;;  %v552_v4 = vmul.f32 2.0, %v1194_v63  ;;  %v542_v5 = vpop.xlane.xlu1 %541  ;;  %v932_v59 = vsel %vm608_vm3, %v106_v52, 0 }
 0x264   :  { %1199 = vrcp.f32 %v542_v5  ;;  %v539_v7 = vpop.xlane.xlu0 %538 }
 0x265   :  { %v597_v8 = vpack.c.bf16 %v589_v2, %v589_v2  ;;  %v566_v9 = vmul.f32 %v1493_v28, %v552_v4  ;;  %1201 = vrcp.f32 %v539_v7  ;;  %v1034_v28 = vld [vmem:[#allocation8 + $0x10] sm:$0xff]  }
 0x266   :  { %v1196_v11 = vpop.eup %1195  ;;  %v1027_v35 = vunpack.c.l.bf16 %v1034_v28 }
 0x267   :  { %v590_v13 = vmul.f32 %v1020_v3, %v566_v9  ;;  %v554_v15 = vmul.f32 2.0, %v1196_v11  ;;  %1119 = vmatmul.mubr.msk.bf16.vlgmr.msra.gmra.mrb[16].mxu0 %vm476_vm2, %v597_v8 }
 0x268   :  { %1129 = vmatpush3.bf16.msra.mxu0 %v702_v10  ;;  %1130 = vmatprep.mubr.msk.bf16.mxu0 %vm1332_vm0, %v1331_v0 }
 0x269   :  { %v598_v16 = vpack.c.bf16 %v590_v13, %v590_v13  ;;  %v567_v17 = vmul.f32 %v1497_v32, %v554_v15  ;;  %1140 = vmatprep.subr.bf16.mxu0 %v1331_v0 }
 0x26a   :  { %v1198_v19 = vpop.eup %1197 }
 0x26b   :  { %v591_v21 = vmul.f32 %v1023_v14, %v567_v17  ;;  %v556_v23 = vmul.f32 2.0, %v1198_v19  ;;  %1125 = vmatmul.mubr.msk.bf16.vlgmr.msra.gmra.mrb[16].mxu1 %vm476_vm2, %v598_v16  ;;  %v548_v24 = vpop.xlane.xlu1 %547 }
 0x26c   :  { %1203 = vrcp.f32 %v548_v24  ;;  %v545_v25 = vpop.xlane.xlu0 %544  ;;  %1135 = vmatpush3.bf16.msra.mxu1 %v748_v18  ;;  %1136 = vmatprep.mubr.msk.bf16.mxu1 %vm1332_vm0, %v1331_v0 }
 0x26d   :  { %v599_v26 = vpack.c.bf16 %v591_v21, %v591_v21  ;;  %v568_v27 = vmul.f32 %v1501_v38, %v556_v23  ;;  %1205 = vrcp.f32 %v545_v25  ;;  %1146 = vmatprep.subr.bf16.mxu1 %v1331_v0  ;;  %v1028_v38 = vunpack.c.h.bf16 %v1034_v28 }
 0x26e   :  { %v1200_v30 = vpop.eup %1199 }
 0x26f   :  { %v1202_v32 = vpop.eup %1201  ;;  %v592_v33 = vmul.f32 %v1024_v22, %v568_v27  ;;  %v560_v34 = vmul.f32 2.0, %v1200_v30  ;;  %1131 = vmatmul.mubr.msk.bf16.vlgmr.msra.gmra.mrb[20].mxu0 %vm476_vm2, %v599_v26 }
 0x270   :  { %v558_v36 = vmul.f32 2.0, %v1202_v32  ;;  %1141 = vmatpush3.bf16.msra.mxu0 %v794_v29  ;;  %1142 = vmatprep.mubr.msk.bf16.mxu0 %vm1332_vm0, %v1331_v0 }
 0x271   :  { %v600_v37 = vpack.c.bf16 %v592_v33, %v592_v33  ;;  %v570_v39 = vmul.f32 %v1505_v42, %v560_v34  ;;  %1152 = vmatprep.subr.bf16.mxu0 %v1331_v0 }
 0x272   :  { %v569_v41 = vmul.f32 %v1507_v43, %v558_v36  ;;  %v1031_v43 = vunpack.c.l.bf16 %v1035_v49 }
 0x273   :  { %1137 = vmatmul.mubr.msk.bf16.vlgmr.msra.gmra.mrb[20].mxu1 %vm476_vm2, %v600_v37  ;;  %v594_v48 = vmul.f32 %v1028_v38, %v570_v39 }
 0x274   :  { %v593_v45 = vmul.f32 %v1027_v35, %v569_v41  ;;  %1147 = vmatpush3.bf16.msra.mxu1 %v840_v40  ;;  %1148 = vmatprep.mubr.msk.bf16.mxu1 %vm1332_vm0, %v1331_v0 }
 0x275   :  { %1158 = vmatprep.subr.bf16.mxu1 %v1331_v0  ;;  %v602_v56 = vpack.c.bf16 %v594_v48, %v594_v48 }
 0x276   :  { %v1204_v50 = vpop.eup %1203  ;;  %v601_v42 = vpack.c.bf16 %v593_v45, %v593_v45 }
 0x277   :  { %v1206_v53 = vpop.eup %1205  ;;  %v564_v54 = vmul.f32 2.0, %v1204_v50 }
 0x278   :  { %v562_v55 = vmul.f32 2.0, %v1206_v53  ;;  %1143 = vmatmul.mubr.msk.bf16.vlgmr.msra.gmra.mrb[24].mxu0 %vm476_vm2, %v601_v42 }
 0x279   :  { %v572_v58 = vmul.f32 %v1513_v46, %v564_v54  ;;  %1153 = vmatpush3.bf16.msra.mxu0 %v886_v51  ;;  %1154 = vmatprep.mubr.msk.bf16.mxu0 %vm1332_vm0, %v1331_v0 }
 0x27a   :  { %v571_v60 = vmul.f32 %v1515_v47, %v562_v55 }
 0x27b   :  { %1149 = vmatmul.mubr.msk.bf16.vlgmr.msra.gmra.mrb[24].mxu1 %vm476_vm2, %v602_v56  ;;  %v596_v62 = vmul.f32 %v1032_v57, %v572_v58 }
 0x27c   :  { %v595_v61 = vmul.f32 %v1031_v43, %v571_v60  ;;  %1159 = vmatpush3.bf16.msra.mxu1 %v932_v59  ;;  %1160 = vmatprep.mubr.msk.bf16.mxu1 %vm1332_vm0, %v1331_v0 }
 0x27d   :  { %v604_v46 = vpack.c.bf16 %v596_v62, %v596_v62 }
 0x27e   :  { %v603_v63 = vpack.c.bf16 %v595_v61, %v595_v61 }
 0x280   :  { %1155 = vmatmul.mubr.msk.bf16.vlgmr.msra.gmra.mrb[28].mxu0 %vm476_vm2, %v603_v63 }
 0x283   :  { %1161 = vmatmul.mubr.msk.bf16.vlgmr.msra.gmra.mrb[28].mxu1 %vm476_vm2, %v604_v46 }
 0x33a   :  { %v646_v1 = vpop.f32.mrb[16].mxu0 }
 0x33b   :  { %974 = vst.msk [vmem:[#allocation10] sm:$0xff] %vm107_vm1, %v646_v1  ;;  %v1120_v2 = vpop.f32.mrb[17].mxu0 }
 0x33c   :  { %v649_v3 = vpop.f32.mrb[18].mxu0 }
 0x33d   :  { %v1121_v47 = vpop.f32.mrb[19].mxu0 }
 0x33e   :  { %v692_v4 = vpop.f32.mrb[16].mxu1 }
 0x33f   :  { %975 = vst.msk [vmem:[#allocation10 + $0x8] sm:$0xff] %vm107_vm1, %v692_v4  ;;  %v1126_v5 = vpop.f32.mrb[17].mxu1 }
 0x340   :  { %v695_v6 = vpop.f32.mrb[18].mxu1 }
 0x341   :  { %v1127_v7 = vpop.f32.mrb[19].mxu1 }
 0x342   :  { %v738_v0 = vpop.f32.mrb[20].mxu0 }
 0x343   :  { %976 = vst.msk [vmem:[#allocation10 + $0x10] sm:$0xff] %vm107_vm1, %v738_v0  ;;  %v1132_v8 = vpop.f32.mrb[21].mxu0 }
 0x344   :  { %v741_v9 = vpop.f32.mrb[22].mxu0 }
 0x345   :  { %v1133_v10 = vpop.f32.mrb[23].mxu0 }
 0x346   :  { %v784_v11 = vpop.f32.mrb[20].mxu1 }
 0x347   :  { %977 = vst.msk [vmem:[#allocation10 + $0x18] sm:$0xff] %vm107_vm1, %v784_v11  ;;  %v1138_v12 = vpop.f32.mrb[21].mxu1 }
 0x348   :  { %v787_v13 = vpop.f32.mrb[22].mxu1 }
 0x349   :  { %v1139_v14 = vpop.f32.mrb[23].mxu1 }
 0x34b   :  { %v830_v15 = vpop.f32.mrb[24].mxu0 }
 0x34c   :  { %978 = vst.msk [vmem:[#allocation10 + $0x20] sm:$0xff] %vm107_vm1, %v830_v15  ;;  %v1144_v16 = vpop.f32.mrb[25].mxu0 }
 0x34d   :  { %v833_v17 = vpop.f32.mrb[26].mxu0 }
 0x34e   :  { %v1145_v18 = vpop.f32.mrb[27].mxu0  ;;  %v876_v19 = vpop.f32.mrb[24].mxu1 }
 0x34f   :  { %979 = vst.msk [vmem:[#allocation10 + $0x28] sm:$0xff] %vm107_vm1, %v876_v19  ;;  %v1150_v20 = vpop.f32.mrb[25].mxu1 }
 0x350   :  { %v879_v21 = vpop.f32.mrb[26].mxu1 }
 0x351   :  { %v1151_v22 = vpop.f32.mrb[27].mxu1 }
 0x353   :  { %v922_v23 = vpop.f32.mrb[28].mxu0 }
 0x354   :  { %980 = vst.msk [vmem:[#allocation10 + $0x30] sm:$0xff] %vm107_vm1, %v922_v23  ;;  %v1156_v24 = vpop.f32.mrb[29].mxu0 }
 0x355   :  { %v925_v25 = vpop.f32.mrb[30].mxu0 }
 0x356   :  { %v1157_v26 = vpop.f32.mrb[31].mxu0  ;;  %v968_v27 = vpop.f32.mrb[28].mxu1 }
 0x357   :  { %981 = vst.msk [vmem:[#allocation10 + $0x38] sm:$0xff] %vm107_vm1, %v968_v27  ;;  %v1162_v28 = vpop.f32.mrb[29].mxu1 }
 0x358   :  { %v971_v29 = vpop.f32.mrb[30].mxu1 }
 0x359   :  { %1306 = shalt.err (!%p1303_p8)
}
 0x35a   :  { %s1307_s13 = scalar_lea.hbm %s1587_s4, 1024 }
 0x35b   :  { %p1308_p9 = scmp.ne.s32.totalorder %s1587_s4, %s1307_s13  ;;  %p1311_p10 = scmp.lt.u32.totalorder %s1307_s13, %s1587_s4 }
 0x35d   :  { %p1313_p11 = pnand %p1311_p10, %p1308_p9 }
 0x35f   :  { %1316 = shalt.err (!%p1313_p11)
}
 0x360   :  { %s1334_s19 = smov 128   ;;  %s1335_s20 = smov 8   ;;  %v1163_v30 = vpop.f32.mrb[31].mxu1 }
 0x361   :  { %993 = dma.vmem_to_hbm [thread:$0]  %s988_s27, 1024, %s1587_s4, [#allocation4], %s1334_s19, %s1334_s19, %s1335_s20  }
 0x362   :  { %1323 = dma.done.wait [#allocation4], 1024  }
 0x363   :  { %1324 = vsyncadd [#allocation4], 4294966272 }
 0x364   :  { %997 = vsyncpa [#allocation3], 1 }
 0x365   :  { %998 = vsyncpa [#allocation6], 1 }
 0x366   :  { %999 = vsyncpa [#allocation9], 1 }
 0x367   :  { %1000 = vsyncpa [#allocation4], 1 }

</bundles_post_ra>
